<compile_context>
chip_gen: v6e
topology: v6e:2x2x1
jax: 0.10.0
libtpu: 0.0.40
codegen_flags: <defaults>
</compile_context>

<pallas_src>
import functools

import jax
import jax.numpy as jnp
from jax.experimental import pallas as pl
from jax.experimental.pallas import tpu as pltpu

HL = 10      # hidden width
IN_F = 4     # iris features
OUT_F = 3    # classes

_SUBLANE = 8  # batch lives on the sublane axis now; tiles only need 8-alignment


def _round_up(n, m):
    return ((n + m - 1) // m) * m


def _cdiv(a, b):
    return -(-a // b)


def _mlp_kernel(x_ref, w1t_ref, b1_ref, w2t_ref, b2_ref, o_ref):
    """One batch tile; batch on sublanes, features on lanes.

    x_ref  : (TB, IN_F)    f32
    w1t_ref: (IN_F, HL)    f32   (= fc1.weight.T)
    b1_ref : (1, HL)       f32
    w2t_ref: (HL, OUT_F)   f32   (= fc2.weight.T)
    b2_ref : (1, OUT_F)    f32
    o_ref  : (TB, OUT_F)   f32
    """
    x = x_ref[...]
    # fc1 + ReLU: (TB, 4) @ (4, 10) -> (TB, 10)
    h = jnp.dot(x, w1t_ref[...], preferred_element_type=jnp.float32)
    h = jnp.maximum(h + b1_ref[...], 0.0)
    # fc2: (TB, 10) @ (10, 3) -> (TB, 3)
    y = jnp.dot(h, w2t_ref[...], preferred_element_type=jnp.float32) + b2_ref[...]
    o_ref[...] = y.astype(o_ref.dtype)


@functools.partial(jax.jit, static_argnames=("block_b",))
def iris_mlp(x, w1, b1, w2, b2, *, block_b=8192):
    """Forward pass: relu(x @ w1.T + b1) @ w2.T + b2.

    x : (B, 4) f32 row-major (as in PyTorch).
    w1: (HL, 4), b1: (HL,), w2: (3, HL), b2: (3,)  -- PyTorch nn.Linear layouts.
    Returns (B, 3) f32.
    """
    B = x.shape[0]

    # Adaptive batch tiling (all static Python on shapes):
    #  * big batches: n_tiles = cdiv(B, block_b) so per-tile padding < 8 rows
    #  * medium batches: at least 2 tiles so v7x's second TensorCore gets work
    #  * small batches: one full-array block (block dims == array dims)
    if B > block_b:
        n_tiles = _cdiv(B, block_b)
    elif B >= 2048:
        n_tiles = 2
    else:
        n_tiles = 1

    if n_tiles == 1:
        tb = B                                   # full-extent block, no alignment needed
    else:
        tb = _round_up(_cdiv(B, n_tiles), _SUBLANE)   # 8-aligned, <= B
    grid = _cdiv(B, tb)                          # last block may be partial; Pallas masks it

    # Tiny one-time layout plumbing on the weights only (tens of floats).
    w1t = w1.T                                   # (IN_F, HL)
    w2t = w2.T                                   # (HL, OUT_F)
    b1r = b1.reshape(1, HL)
    b2r = b2.reshape(1, OUT_F)

    return pl.pallas_call(
        _mlp_kernel,
        out_shape=jax.ShapeDtypeStruct((B, OUT_F), x.dtype),
        grid_spec=pl.GridSpec(
            grid=(grid,),
            in_specs=[
                # batch-tiled activations: pipelined / double-buffered over the grid
                pl.BlockSpec((tb, IN_F), lambda i: (i, 0)),
                # weights & biases: full extent + constant index -> DMA'd once,
                # resident in VMEM for all batch tiles
                pl.BlockSpec((IN_F, HL), lambda i: (0, 0)),
                pl.BlockSpec((1, HL), lambda i: (0, 0)),
                pl.BlockSpec((HL, OUT_F), lambda i: (0, 0)),
                pl.BlockSpec((1, OUT_F), lambda i: (0, 0)),
            ],
            out_specs=pl.BlockSpec((tb, OUT_F), lambda i: (i, 0)),
        ),
        compiler_params=pltpu.CompilerParams(
            # batch tiles are independent -> shard across TensorCores on v7x
            dimension_semantics=("parallel",),
            # lane-padded (tb, 4/10/3) buffers at tb=8192 use ~20-25 MiB;
            # raise above v5e's 16 MiB scoped default, stay under v7x's 64 MiB.
            vmem_limit_bytes=48 * 1024 * 1024,
        ),
    )(x, w1t, b1r, w2t, b2r)


def init_params(key):
    # Deterministic init mimicking nn.Linear (uniform in +-1/sqrt(fan_in)),
    # using PyTorch's (out_features, in_features) weight layout.
    k1, k2, k3, k4 = jax.random.split(key, 4)
    bound1 = 1.0 / jnp.sqrt(IN_F)
    bound2 = 1.0 / jnp.sqrt(HL)
    w1 = jax.random.uniform(k1, (HL, IN_F), jnp.float32, -bound1, bound1)
    b1 = jax.random.uniform(k2, (HL,), jnp.float32, -bound1, bound1)
    w2 = jax.random.uniform(k3, (OUT_F, HL), jnp.float32, -bound2, bound2)
    b2 = jax.random.uniform(k4, (OUT_F,), jnp.float32, -bound2, bound2)
    return w1, b1, w2, b2


if __name__ == "__main__":
    key = jax.random.PRNGKey(0)
    kp, *kxs = jax.random.split(key, 5)

    w1, b1, w2, b2 = init_params(kp)

    def ref_fwd(xx):
        return jnp.maximum(xx @ w1.T + b1, 0.0) @ w2.T + b2

    # B=8    : tiny single-tile batch
    # B=150  : iris-dataset size, not 8-aligned (full-array single block)
    # B=3000 : 2 tiles (v7x dual-TC path), partial last block
    # B=20000: >2 tiles, adaptive tile sizing, partial last block
    for k, B in zip(kxs, (8, 150, 3000, 20000)):
        x = jax.random.normal(k, (B, IN_F), jnp.float32)
        out = jax.block_until_ready(iris_mlp(x, w1, b1, w2, b2))
        assert out.shape == (B, OUT_F)
        assert jnp.allclose(out, ref_fwd(x), atol=1e-4, rtol=1e-5)

    print("KERNEL_OK")
</pallas_src>

<mosaic_0001>
module attributes {stable_mosaic.version = 11 : i64} {
  func.func @_mlp_kernel(%arg0: i32, %arg1: memref<8x4xf32, #tpu.memory_space<vmem>>, %arg2: memref<4x10xf32, #tpu.memory_space<vmem>>, %arg3: memref<1x10xf32, #tpu.memory_space<vmem>>, %arg4: memref<10x3xf32, #tpu.memory_space<vmem>>, %arg5: memref<1x3xf32, #tpu.memory_space<vmem>>, %arg6: memref<8x3xf32, #tpu.memory_space<vmem>>) attributes {dimension_semantics = [#tpu.dimension_semantics<parallel>], iteration_bounds = array<i64: 1>, scalar_prefetch = 0 : i64, scratch_operands = 0 : i64, tpu.core_type = #tpu.core_type<tc>, window_params = [{transform_indices = @transform_0, window_bounds = array<i64: 8, 4>}, {pipeline_mode = #tpu.pipeline_mode<synchronous>, transform_indices = @transform_1, window_bounds = array<i64: 4, 10>}, {pipeline_mode = #tpu.pipeline_mode<synchronous>, transform_indices = @transform_2, window_bounds = array<i64: 1, 10>}, {pipeline_mode = #tpu.pipeline_mode<synchronous>, transform_indices = @transform_3, window_bounds = array<i64: 10, 3>}, {pipeline_mode = #tpu.pipeline_mode<synchronous>, transform_indices = @transform_4, window_bounds = array<i64: 1, 3>}, {transform_indices = @transform_5, window_bounds = array<i64: 8, 3>}]} {
    %c0 = arith.constant 0 : index
    %c0_0 = arith.constant 0 : index
    %0 = vector.load %arg1[%c0, %c0_0] : memref<8x4xf32, #tpu.memory_space<vmem>>, vector<8x4xf32>
    %c0_1 = arith.constant 0 : index
    %c0_2 = arith.constant 0 : index
    %1 = vector.load %arg2[%c0_1, %c0_2] : memref<4x10xf32, #tpu.memory_space<vmem>>, vector<4x10xf32>
    %cst = arith.constant dense<0.000000e+00> : vector<8x10xf32>
    %2 = tpu.matmul %0, %1, %cst {dimension_numbers = #tpu.dot_dimension_numbers<[1], [0], [0], [1], [0, 0, 1, 1], [], []>} : vector<8x4xf32>, vector<4x10xf32>, vector<8x10xf32> -> vector<8x10xf32>
    %c0_3 = arith.constant 0 : index
    %c0_4 = arith.constant 0 : index
    %3 = vector.load %arg3[%c0_3, %c0_4] : memref<1x10xf32, #tpu.memory_space<vmem>>, vector<1x10xf32>
    %4 = vector.broadcast %3 : vector<1x10xf32> to vector<8x10xf32>
    %5 = arith.addf %2, %4 : vector<8x10xf32>
    %cst_5 = arith.constant 0.000000e+00 : f32
    %6 = vector.broadcast %cst_5 : f32 to vector<8x10xf32>
    %7 = arith.maximumf %5, %6 : vector<8x10xf32>
    %c0_6 = arith.constant 0 : index
    %c0_7 = arith.constant 0 : index
    %8 = vector.load %arg4[%c0_6, %c0_7] : memref<10x3xf32, #tpu.memory_space<vmem>>, vector<10x3xf32>
    %cst_8 = arith.constant dense<0.000000e+00> : vector<8x3xf32>
    %9 = tpu.matmul %7, %8, %cst_8 {dimension_numbers = #tpu.dot_dimension_numbers<[1], [0], [0], [1], [0, 0, 1, 1], [], []>} : vector<8x10xf32>, vector<10x3xf32>, vector<8x3xf32> -> vector<8x3xf32>
    %c0_9 = arith.constant 0 : index
    %c0_10 = arith.constant 0 : index
    %10 = vector.load %arg5[%c0_9, %c0_10] : memref<1x3xf32, #tpu.memory_space<vmem>>, vector<1x3xf32>
    %11 = vector.broadcast %10 : vector<1x3xf32> to vector<8x3xf32>
    %12 = arith.addf %9, %11 : vector<8x3xf32>
    %c0_11 = arith.constant 0 : index
    %c0_12 = arith.constant 0 : index
    %13 = vector.load %arg6[%c0_11, %c0_12] : memref<8x3xf32, #tpu.memory_space<vmem>>, vector<8x3xf32>
    tpu.vector_store %arg6[%c0_11, %c0_12], %12 {strides = array<i32>} : memref<8x3xf32, #tpu.memory_space<vmem>>, vector<8x3xf32>,
    return
  }
  func.func @transform_0(%arg0: i32) -> (i32, i32) {
    %c0_i32 = arith.constant 0 : i32
    %c0_i32_0 = arith.constant 0 : i32
    return %arg0, %c0_i32 : i32, i32
  }
  func.func @transform_1(%arg0: i32) -> (i32, i32) {
    %c0_i32 = arith.constant 0 : i32
    %c0_i32_0 = arith.constant 0 : i32
    %c0_i32_1 = arith.constant 0 : i32
    return %c0_i32, %c0_i32_0 : i32, i32
  }
  func.func @transform_2(%arg0: i32) -> (i32, i32) {
    %c0_i32 = arith.constant 0 : i32
    %c0_i32_0 = arith.constant 0 : i32
    %c0_i32_1 = arith.constant 0 : i32
    return %c0_i32, %c0_i32_0 : i32, i32
  }
  func.func @transform_3(%arg0: i32) -> (i32, i32) {
    %c0_i32 = arith.constant 0 : i32
    %c0_i32_0 = arith.constant 0 : i32
    %c0_i32_1 = arith.constant 0 : i32
    return %c0_i32, %c0_i32_0 : i32, i32
  }
  func.func @transform_4(%arg0: i32) -> (i32, i32) {
    %c0_i32 = arith.constant 0 : i32
    %c0_i32_0 = arith.constant 0 : i32
    %c0_i32_1 = arith.constant 0 : i32
    return %c0_i32, %c0_i32_0 : i32, i32
  }
  func.func @transform_5(%arg0: i32) -> (i32, i32) {
    %c0_i32 = arith.constant 0 : i32
    %c0_i32_0 = arith.constant 0 : i32
    return %arg0, %c0_i32 : i32, i32
  }
}

</mosaic_0001>

<bundles_post_ra>
// kernel: iris_mlp.1
= control target key start
LH: loop header
LB: loop body
LE: loop exit
PB: predicated region body
PF: predicated region fallthrough
CT: control target
= control target key end

     0   :  { %vm33_vm0 = vcmask 1043456   ;;  %vm29_vm1 = vcmask 31744   ;;  %v226_v0 = vmov 0.0   ;;  %vm227_vm2 = vmmov 0   ;;  %s279_s1 = inlined_call_operand.vmem [shape: f32[4,10], index: 1, kind: input, shape index: {}]   ;;  %s280_s0 = inlined_call_operand.vmem [shape: f32[8,4], index: 0, kind: input, shape index: {}]   ;;  %s281_s3 = inlined_call_operand.vmem [shape: f32[10,3], index: 3, kind: input, shape index: {}]   ;;  %s282_s2 = inlined_call_operand.vmem [shape: f32[1,10], index: 2, kind: input, shape index: {}]   ;;  %s283_s4 = inlined_call_operand.vmem [shape: f32[1,3], index: 4, kind: input, shape index: {}]   ;;  %s284_s5 = inlined_call_operand.vmem [shape: f32[8,3], index: 5, kind: output, shape index: {}]  }
   0x1   :  { %212 = vmatprep.subr.mxu0 %v226_v0  ;;  %v21_v1 = vld [vmem:[%s279_s1] sm:$0xf]  ;;  %214 = vmatprep.mubr.msk.f32.mxu0 %vm227_vm2, %v226_v0  ;;  %v109_v3 = vld [vmem:[%s281_s3 + $0x8] sm:$0x3]  ;;  %vm121_vm3 = vcmask 1041408   ;;  %vm117_vm4 = vcmask 80896  }
   0x2   :  { %v20_v2 = vld [vmem:[%s280_s0] sm:$0xff]  ;;  %213 = vmatpush3.msk.msra.mxu0 %vm33_vm0, %v21_v1  ;;  %217 = vmatprep.subr.mxu1 %v226_v0  ;;  %vm195_vm5 = vcmask 23552  }
   0x3   :  { %215 = vmatmul.mubr.msk.f32.vlgmr.msra.gmra.mxu0 %vm29_vm1, %v20_v2  ;;  %221 = vmatprep.mubr.msk.f32.mxu1 %vm227_vm2, %v226_v0  ;;  %v108_v4 = vld [vmem:[%s281_s3] sm:$0xff] }
   0x4   :  { %218 = vmatpush3.msk.msra.mxu1 %vm121_vm3, %v109_v3  ;;  %v201_v5 = vld [vmem:[%s282_s2] ss:$0 sm:$0xff] }
   0x5   :  { %219 = vmatprep.subr.mxu1 %v226_v0  ;;  %v204_v10 = vld [vmem:[%s283_s4] ss:$0 sm:$0xff] }
   0x6   :  { %220 = vmatpush3.msra.mxu1 %v108_v4 }
  0xc3   :  { %v103_v6 = vpop.f32.mrf.mxu0 }
  0xc4   :  { %v104_v7 = vadd.f32 %v201_v5, %v103_v6 }
  0xc5   :  { %v216_v8 = vpop.f32.mrf.mxu0 }
  0xc6   :  { %v107_v9 = vmax.f32 %v104_v7, 0.0 }
  0xc8   :  { %222 = vmatmul.mubr.msk.f32.vlgmr.msra.gmra.mxu1 %vm117_vm4, %v107_v9 }
 0x188   :  { %v191_v11 = vpop.f32.mrf.mxu1 }
 0x189   :  { %v192_v12 = vadd.f32 %v204_v10, %v191_v11 }
 0x18a   :  { %v223_v13 = vpop.f32.mrf.mxu1 }
 0x18b   :  { %196 = vst.msk [vmem:[%s284_s5] sm:$0xff] %vm195_vm5, %v192_v12 }

</bundles_post_ra>
